<compile_context>
chip_gen: v5e
topology: v5e:2x2
jax: 0.10.0
libtpu: 0.0.40
codegen_flags: <defaults>
</compile_context>

<pallas_src>
import functools

import jax
import jax.numpy as jnp
from jax.experimental import pallas as pl
from jax.experimental.pallas import tpu as pltpu

LANE = 128
TARGET_BLOCK_BYTES = 4 * 1024 * 1024   # ~4 MiB block: 2 operands x 2 buffers = 16 MiB pipeline
SMALL_INPUT_BYTES = 512 * 1024         # below this, plain jnp.clip (fusable, no launch overhead)
VMEM_LIMIT_BYTES = 32 * 1024 * 1024    # required on v5e (16 MiB default); safe on v6e/v7x


def _sublane_pack(dtype):
    """Rows per packed tile: 8 for 4-byte, 16 for 2-byte, 32 for 1-byte dtypes."""
    itemsize = jnp.dtype(dtype).itemsize
    return max(8, 32 // max(1, itemsize))


def _round_up(v, m):
    return ((v + m - 1) // m) * m


def _clamp_kernel(x_ref, o_ref, *, min_val, max_val):
    # min_val / max_val are Python scalars matching the input's dtype kind
    # (int for integer inputs, float otherwise) baked in via functools.partial,
    # so they fold into the VPU clip as immediates with no dtype promotion.
    o_ref[...] = jnp.clip(x_ref[...], min_val, max_val).astype(o_ref.dtype)


def clamp_pallas(x, min_val=0, max_val=1, *, tile_rows=None, force_pallas=False):
    """Elementwise clamp via a Pallas TPU kernel (any input shape / dtype)."""
    orig_shape = x.shape
    dtype = x.dtype
    n = x.size
    itemsize = jnp.dtype(dtype).itemsize

    # Keep the bounds in the input dtype's kind so integer tensors are not
    # round-tripped through float32 (matches torch.clamp on int tensors).
    if jnp.issubdtype(dtype, jnp.integer):
        lo, hi = int(min_val), int(max_val)
    else:
        lo, hi = float(min_val), float(max_val)

    # Small-input bypass: pallas_call/DMA setup overhead dominates and an
    # opaque custom call blocks XLA fusion with neighbouring ops.
    if not force_pallas and n * itemsize < SMALL_INPUT_BYTES:
        return jnp.clip(x, lo, hi)

    pack = _sublane_pack(dtype)

    rows = pl.cdiv(n, LANE)
    total = rows * LANE
    x_flat = jnp.ravel(x)
    padded = total != n
    if padded:
        # Only when n is not a multiple of 128 (< 128 pad elements); for
        # lane-aligned sizes the reshape below is copy-free.
        x_flat = jnp.pad(x_flat, (0, total - n))
    x2d = x_flat.reshape(rows, LANE)

    # Block rows from a fixed byte budget (dtype-independent ~4 MiB blocks),
    # rounded to the dtype's sublane pack so the BlockSpec stays tile-aligned.
    if tile_rows is None:
        tile_rows = max(pack, (TARGET_BLOCK_BYTES // (LANE * itemsize)) // pack * pack)
    else:
        tile_rows = max(pack, (int(tile_rows) // pack) * pack)

    if rows > tile_rows:
        tr = tile_rows
    elif rows > 8 * pack:
        # Split mid-size inputs into >=2 parallel blocks so both v7x
        # TensorCores issue DMAs; harmless on single-TC v5e/v6e.
        tr = min(tile_rows, _round_up(pl.cdiv(rows, 2), pack))
    else:
        tr = rows  # single block equal to the full array (any row count OK)

    grid = (pl.cdiv(rows, tr),)  # ragged last block: padded read, masked write

    kernel = functools.partial(_clamp_kernel, min_val=lo, max_val=hi)

    out2d = pl.pallas_call(
        kernel,
        out_shape=jax.ShapeDtypeStruct((rows, LANE), dtype),
        grid=grid,
        in_specs=[pl.BlockSpec((tr, LANE), lambda i: (i, 0))],
        out_specs=pl.BlockSpec((tr, LANE), lambda i: (i, 0)),
        # 1:1 elementwise map -> output may reuse the input buffer.  Free win
        # under jit (halves peak HBM footprint); XLA inserts a defensive copy
        # if the operand is still live, so it is always correct.
        input_output_aliases={0: 0},
        compiler_params=pltpu.CompilerParams(
            dimension_semantics=("parallel",),
            vmem_limit_bytes=VMEM_LIMIT_BYTES,
        ),
        cost_estimate=pl.CostEstimate(
            flops=2 * total,
            transcendentals=0,
            bytes_accessed=2 * total * itemsize,
        ),
    )(x2d)

    out_flat = out2d.reshape(-1)
    if padded:
        out_flat = out_flat[:n]
    return out_flat.reshape(orig_shape)


class ClampModule:
    """JAX/Pallas equivalent of the PyTorch ClampModule (no parameters)."""

    def __init__(self, min=0, max=1):
        self.min = min
        self.max = max

    def __call__(self, data):
        return clamp_pallas(data, self.min, self.max)


if __name__ == "__main__":
    key = jax.random.PRNGKey(0)
    mod = ClampModule(min=0, max=1)

    # 1) Small NCHW input consistent with the module's usage (bypass fast path).
    x_small = jax.random.normal(jax.random.fold_in(key, 0), (2, 4, 16, 16),
                                dtype=jnp.float32) * 2.0
    y_small = jax.block_until_ready(mod(x_small))
    assert y_small.shape == x_small.shape and y_small.dtype == x_small.dtype
    assert jnp.allclose(y_small, jnp.clip(x_small, 0.0, 1.0))

    # 2) Force the Pallas kernel on the same small input (single full-array block).
    y_forced = jax.block_until_ready(clamp_pallas(x_small, 0, 1, force_pallas=True))
    assert jnp.allclose(y_forced, jnp.clip(x_small, 0.0, 1.0))

    # 3) Non-multiple-of-128 size + multi-block ragged grid (small tile_rows
    #    keeps the test tiny while exercising the masked-write path).
    x_ragged = jax.random.normal(jax.random.fold_in(key, 1), (3, 5, 7, 41),
                                 dtype=jnp.float32) * 3.0
    y_ragged = jax.block_until_ready(
        clamp_pallas(x_ragged, 0, 1, tile_rows=8, force_pallas=True))
    assert y_ragged.shape == x_ragged.shape
    assert jnp.allclose(y_ragged, jnp.clip(x_ragged, 0.0, 1.0))

    # 4) Integer dtype path: bounds stay integral, no float32 round-trip,
    #    and the grid splits into 2 parallel blocks.
    x_int = jax.random.randint(jax.random.fold_in(key, 2), (4, 64, 128), -5, 6,
                               dtype=jnp.int32)
    y_int = jax.block_until_ready(clamp_pallas(x_int, 0, 1, force_pallas=True))
    assert y_int.dtype == jnp.int32
    assert jnp.array_equal(y_int, jnp.clip(x_int, 0, 1))

    print("KERNEL_OK")
</pallas_src>

<mosaic_0001>
module attributes {stable_mosaic.version = 11 : i64} {
  func.func @_clamp_kernel(%arg0: i32, %arg1: memref<16x128xf32, #tpu.memory_space<vmem>>, %arg2: memref<16x128xf32, #tpu.memory_space<vmem>>) attributes {dimension_semantics = [#tpu.dimension_semantics<parallel>], iteration_bounds = array<i64: 1>, scalar_prefetch = 0 : i64, scratch_operands = 0 : i64, tpu.core_type = #tpu.core_type<tc>, window_params = [{transform_indices = @transform_0, window_bounds = array<i64: 16, 128>}, {transform_indices = @transform_1, window_bounds = array<i64: 16, 128>}]} {
    %c0 = arith.constant 0 : index
    %c0_0 = arith.constant 0 : index
    %0 = vector.load %arg1[%c0, %c0_0] : memref<16x128xf32, #tpu.memory_space<vmem>>, vector<16x128xf32>
    %cst = arith.constant 0.000000e+00 : f32
    %cst_1 = arith.constant 1.000000e+00 : f32
    %1 = vector.broadcast %cst : f32 to vector<16x128xf32>
    %2 = arith.maximumf %1, %0 : vector<16x128xf32>
    %3 = vector.broadcast %cst_1 : f32 to vector<16x128xf32>
    %4 = arith.minimumf %3, %2 : vector<16x128xf32>
    %c0_2 = arith.constant 0 : index
    %c0_3 = arith.constant 0 : index
    %5 = vector.load %arg2[%c0_2, %c0_3] : memref<16x128xf32, #tpu.memory_space<vmem>>, vector<16x128xf32>
    tpu.vector_store %arg2[%c0_2, %c0_3], %4 {strides = array<i32>} : memref<16x128xf32, #tpu.memory_space<vmem>>, vector<16x128xf32>,
    return
  }
  func.func @transform_0(%arg0: i32) -> (i32, i32) {
    %c0_i32 = arith.constant 0 : i32
    %c0_i32_0 = arith.constant 0 : i32
    return %arg0, %c0_i32 : i32, i32
  }
  func.func @transform_1(%arg0: i32) -> (i32, i32) {
    %c0_i32 = arith.constant 0 : i32
    %c0_i32_0 = arith.constant 0 : i32
    return %arg0, %c0_i32 : i32, i32
  }
}

</mosaic_0001>

<bundles_post_ra>
// kernel: tpu_custom_call.1
= control target key start
LH: loop header
LB: loop body
LE: loop exit
PB: predicated region body
PF: predicated region fallthrough
CT: control target
= control target key end

     0   :  { %6 = vsyncpa [#allocation3], 0  ;;  %s128_s0 = inlined_call_operand.hbm [shape: f32[16,128], index: 0, kind: input, shape index: {}, may-alias: {0,1}]   ;;  %s129_s1 = inlined_call_operand.hbm [shape: f32[16,128], index: 1, kind: output, shape index: {}, may-alias: {0,1}]  }
   0x1   :  { %7 = vsyncpa [#allocation4], 0  ;;  %s12_s8 = sshll.u32 %s128_s0, 4  ;;  %s108_s9 = smov [#allocation2]   ;;  %s13_s8 = int_to_ptr.hbm [resolvable:$true] %s12_s8 }
   0x2   :  { %s14_s10 = sshll.u32 %s108_s9, 4  ;;  %s109_s11 = smov 128   ;;  %s15_s10 = int_to_ptr.vmem [resolvable:$true] %s14_s10 }
   0x3   :  { %s110_s12 = smov 8  }
   0x4   :  { %20 = dma.hbm_to_vmem [thread:$0]  %s13_s8, 256, %s15_s10, [#allocation3], %s109_s11, %s109_s11, %s110_s12  }
   0x5   :  { %104 = dma.done.wait [#allocation3], 256  }
   0x6   :  { %105 = vsyncadd [#allocation3], 4294967040  ;;  %v25_v0 = vld [vmem:[#allocation2] sm:$0xff]  ;;  %v26_v1 = vld [vmem:[#allocation2 + $0x8] sm:$0xff]  ;;  %s111_s13 = smov [#allocation5]   ;;  %s39_s17 = sshll.u32 %s129_s1, 4  ;;  %s40_s17 = int_to_ptr.hbm [resolvable:$true] %s39_s17 }
   0x7   :  { %v27_v2 = vmax.f32 %v25_v0, 0.0  ;;  %v28_v3 = vmax.f32 %v26_v1, 0.0  ;;  %s37_s14 = sshll.u32 %s111_s13, 4  ;;  %s38_s14 = int_to_ptr.vmem [resolvable:$true] %s37_s14 }
   0x9   :  { %v29_v4 = vmin.f32 %v27_v2, 1.0  ;;  %v30_v5 = vmin.f32 %v28_v3, 1.0 }
   0xb   :  { %31 = vst [vmem:[#allocation5] sm:$0xff] %v29_v4 }
   0xc   :  { %32 = vst [vmem:[#allocation5 + $0x8] sm:$0xff] %v30_v5 }
   0xd   :  { %45 = dma.vmem_to_hbm [thread:$0]  %s38_s14, 256, %s40_s17, [#allocation4], %s109_s11, %s109_s11, %s110_s12  }
   0xe   :  { %106 = dma.done.wait [#allocation4], 256  }
   0xf   :  { %107 = vsyncadd [#allocation4], 4294967040 }
  0x10   :  { %50 = vsyncpa [#allocation3], 1 }
  0x11   :  { %51 = vsyncpa [#allocation4], 1 }

</bundles_post_ra>
